<compile_context>
chip_gen: v6e
topology: v6e:2x2x1
jax: 0.10.0
libtpu: 0.0.40
codegen_flags: <defaults>
</compile_context>

<pallas_src>
import inspect

import jax
import jax.numpy as jnp
from jax import lax
from jax.experimental import pallas as pl
from jax.experimental.pallas import tpu as pltpu


_LANE = 128     # output last dim padded to a multiple of this (lane-dense stores)
_SUBLANE = 8    # row tiles must be a multiple of this
_MIB = 1024 * 1024


def _round_up(x, m):
    return (x + m - 1) // m * m


def _supports_pipeline_mode():
    """Feature-detect BlockSpec(pipeline_mode=...) + pl.Buffered (no trial compile)."""
    if not hasattr(pl, "Buffered"):
        return False
    try:
        params = inspect.signature(pl.BlockSpec).parameters
    except (TypeError, ValueError):
        return False
    return "pipeline_mode" in params


_HAS_PIPELINE_MODE = _supports_pipeline_mode()


def _vmem_capacity_bytes():
    """Physical per-core VMEM, queried at trace time; conservative fallback."""
    try:
        info = pltpu.get_tpu_info()
    except Exception:
        return 64 * _MIB     # assume the smallest (v7x-class) part if unknown
    for attr in ("vmem_capacity_bytes", "vmem_bytes", "vmem_size_bytes"):
        cap = getattr(info, attr, None)
        if cap:
            return int(cap)
    return 64 * _MIB


def _vmem_plan():
    """(vmem_limit_bytes, tile budget) with headroom for compiler scratch."""
    cap = _vmem_capacity_bytes()
    if cap > 96 * _MIB:
        limit = min(cap - 16 * _MIB, 112 * _MIB)   # 128-MiB parts (v5e / v6e)
    else:
        limit = min(cap - 12 * _MIB, 52 * _MIB)    # 64-MiB parts (v7x)
    limit = max(limit, 24 * _MIB)
    budget = max(limit - 8 * _MIB, 16 * _MIB)
    return int(limit), int(budget)


def _bf16_elementwise_ok():
    """bf16 VALU is native on v6e / v7x; keep f32 elsewhere (v5e has no bf16 VPU)."""
    try:
        kind = jax.devices()[0].device_kind.lower()
    except Exception:
        return False
    return any(s in kind for s in ("v6", "v7", "tpu7"))


def _final_layer_kernel(x_ref, shift_ref, scale1_ref, w_ref, b_ref, o_ref):
    """One (tl, H) row tile of: LayerNorm -> t2i_modulate -> Linear.

    x_ref:      (tl, H)        activation rows (leading batch block dim squeezed)
    shift_ref:  (1, H)         per-batch shift            (elementwise dtype)
    scale1_ref: (1, H)         per-batch (1 + scale)      (elementwise dtype)
    w_ref:      (H, C_pad)     linear weight, transposed + lane-padded (storage dtype)
    b_ref:      (1, C_pad) f32 linear bias, lane-padded
    o_ref:      (tl, C_pad)    output rows
    """
    h_inv = 1.0 / float(x_ref.shape[-1])
    xf = x_ref[...].astype(jnp.float32)

    # One-pass LayerNorm statistics (both reductions issue back-to-back on the
    # XLU; stats stay in f32).  eps = 1e-6 matches the reference module.
    mean = jnp.sum(xf, axis=-1, keepdims=True) * h_inv
    meansq = jnp.sum(xf * xf, axis=-1, keepdims=True) * h_inv
    var = jnp.maximum(meansq - mean * mean, 0.0)
    rstd = lax.rsqrt(var + 1e-6)

    # Fused normalize + t2i_modulate: (x - mean) * rstd * (1 + scale) + shift.
    shift = shift_ref[...]
    scale1 = scale1_ref[...]
    mod = ((xf - mean) * rstd).astype(shift.dtype) * scale1 + shift

    # Linear on the MXU in the weight's storage dtype, accumulating in f32.
    w = w_ref[...]
    out = jnp.dot(mod.astype(w.dtype), w, preferred_element_type=jnp.float32)
    o_ref[...] = (out + b_ref[...]).astype(o_ref.dtype)


def _choose_row_tile(L, H, C_pad, x_itemsize, w_itemsize, o_itemsize,
                     vmem_budget_bytes, weight_buffers):
    """Largest sensible row tile that fits the VMEM budget."""
    # Resident parameters: weight (x1 if single-buffered, x2 otherwise), bias,
    # shift / (1+scale) blocks.
    fixed = (weight_buffers * H * C_pad * w_itemsize
             + 2 * C_pad * 4
             + 4 * H * 4)
    # Per activation row: double-buffered x / out blocks plus the f32
    # temporaries the fused body keeps live in VMEM.
    per_row = (2 * H * x_itemsize        # x tile (double buffered)
               + 2 * C_pad * o_itemsize  # out tile (double buffered)
               + 3 * H * 4               # live f32 intermediates
               + C_pad * 4)              # f32 matmul accumulator
    avail = max(vmem_budget_bytes - fixed, _SUBLANE * per_row)
    tl = min(1024, avail // per_row)
    if tl >= 256:
        tl = (tl // 256) * 256            # MXU-friendly M
    else:
        tl = max(_SUBLANE, (tl // _SUBLANE) * _SUBLANE)
    return int(min(tl, _round_up(L, _SUBLANE)))


def final_layer_forward(x, cond_BD, scale_shift_table, weight, bias, t=None, *,
                        tl=None, vmem_limit_bytes=None, vmem_budget_bytes=None,
                        return_padded=False):
    """x: (B, L, H), cond_BD: (B, 1, H) or (B, 2, H), scale_shift_table: (2, H),
    weight: (C, H) (PyTorch nn.Linear layout), bias: (C,), t: (B, H) or None.

    If return_padded=True the raw (B, L_pad, C_pad) kernel output is returned
    (valid data in [:, :L, :C]) so a downstream consumer can avoid the extra
    HBM copy of the final slice.
    """
    B, L, H = x.shape
    C = weight.shape[0]

    limit_default, budget_default = _vmem_plan()
    if vmem_limit_bytes is None:
        vmem_limit_bytes = limit_default
    if vmem_budget_bytes is None:
        vmem_budget_bytes = budget_default

    # Elementwise dtype for the modulate stage (bf16 only where the VPU has it).
    ew_dtype = jnp.bfloat16 if (jnp.dtype(x.dtype) == jnp.bfloat16
                                and _bf16_elementwise_ok()) else jnp.float32

    # ---- parameter glue (tiny, plain JAX, computed once in f32) ------------
    ss = scale_shift_table[None].astype(jnp.float32)              # (1, 2, H)
    if t is not None:
        ss = ss + t[:, None, :].astype(jnp.float32)               # (B, 2, H)
    ss = ss + cond_BD.astype(jnp.float32)                         # (B, 2, H)
    shift = ss[:, 0:1, :].astype(ew_dtype)                        # (B, 1, H)
    scale1 = (1.0 + ss[:, 1:2, :]).astype(ew_dtype)               # (B, 1, H), hoisted 1+scale

    # ---- lane-dense output layout: pad C up to a multiple of 128 -----------
    C_pad = _round_up(C, _LANE)
    w_t = weight.T                                                # (H, C)
    if C_pad != C:
        w_t = jnp.pad(w_t, ((0, 0), (0, C_pad - C)))
        b_p = jnp.pad(bias, (0, C_pad - C))
    else:
        b_p = bias
    b_p = b_p[None, :].astype(jnp.float32)                        # (1, C_pad)

    # ---- row tiling ---------------------------------------------------------
    weight_buffers = 1 if _HAS_PIPELINE_MODE else 2
    if tl is None:
        tl = _choose_row_tile(L, H, C_pad,
                              jnp.dtype(x.dtype).itemsize,
                              jnp.dtype(w_t.dtype).itemsize,
                              jnp.dtype(x.dtype).itemsize,
                              vmem_budget_bytes, weight_buffers)
    tl = max(_SUBLANE, _round_up(min(int(tl), _round_up(L, _SUBLANE)), _SUBLANE))

    # v7x has 2 TensorCores: a single-batch call should still expose >= 2
    # parallel grid steps so both cores get work (harmless on 1-TC chips).
    if B == 1 and L > _SUBLANE:
        half = _round_up((L + 1) // 2, _SUBLANE)
        if tl > half:
            tl = (half // 256) * 256 if half >= 256 else half

    L_pad = _round_up(L, tl)
    x_p = jnp.pad(x, ((0, 0), (0, L_pad - L), (0, 0))) if L_pad != L else x
    grid = (B, L_pad // tl)
    total_steps = B * (L_pad // tl)

    # ---- BlockSpecs ---------------------------------------------------------
    def _spec(shape, imap, nbuf=None):
        if nbuf is not None and _HAS_PIPELINE_MODE:
            return pl.BlockSpec(shape, imap, pipeline_mode=pl.Buffered(nbuf))
        return pl.BlockSpec(shape, imap)

    # Small row tiles expose per-step DMA latency: deepen the x pipeline then.
    x_nbuf = 3 if (tl < 256 and total_steps >= 3) else None

    x_spec = _spec((None, tl, H), lambda bi, li: (bi, li, 0), x_nbuf)
    shift_spec = pl.BlockSpec((None, 1, H), lambda bi, li: (bi, 0, 0))
    scale_spec = pl.BlockSpec((None, 1, H), lambda bi, li: (bi, 0, 0))
    w_spec = _spec((H, C_pad), lambda bi, li: (0, 0), 1)     # resident weight
    b_spec = _spec((1, C_pad), lambda bi, li: (0, 0), 1)     # resident bias
    out_spec = pl.BlockSpec((None, tl, C_pad), lambda bi, li: (bi, li, 0))

    out = pl.pallas_call(
        _final_layer_kernel,
        out_shape=jax.ShapeDtypeStruct((B, L_pad, C_pad), x.dtype),
        grid_spec=pltpu.PrefetchScalarGridSpec(
            num_scalar_prefetch=0,
            grid=grid,
            in_specs=[x_spec, shift_spec, scale_spec, w_spec, b_spec],
            out_specs=out_spec,
        ),
        compiler_params=pltpu.CompilerParams(
            dimension_semantics=("parallel", "parallel"),
            vmem_limit_bytes=int(vmem_limit_bytes),
        ),
    )(x_p, shift, scale1, w_t, b_p)

    if return_padded:
        return out                         # (B, L_pad, C_pad); data in [:, :L, :C]
    return out[:, :L, :C]


def final_layer_reference(x, cond_BD, scale_shift_table, weight, bias, t=None):
    ss = scale_shift_table[None]
    if t is not None:
        ss = ss + t[:, None, :]
    ss = ss + cond_BD
    shift = ss[:, 0:1, :]
    scale = ss[:, 1:2, :]
    mean = jnp.mean(x, axis=-1, keepdims=True)
    var = jnp.mean(jnp.square(x - mean), axis=-1, keepdims=True)
    xn = (x - mean) / jnp.sqrt(var + 1e-6)
    mod = xn * (1 + scale) + shift
    return mod @ weight.T + bias


if __name__ == "__main__":
    key = jax.random.PRNGKey(0)

    # ---- case 1: small f32 shapes, with and without the optional timestep t --
    B, L, H, C = 2, 16, 32, 16   # batch, seq, hidden_size, out_channels
    kx, kc, kt, ks, kw, kb, key = jax.random.split(key, 7)
    x = jax.random.normal(kx, (B, L, H), dtype=jnp.float32)
    cond_BD = jax.random.normal(kc, (B, 1, H), dtype=jnp.float32)
    t = jax.random.normal(kt, (B, H), dtype=jnp.float32)
    scale_shift_table = jax.random.normal(ks, (2, H), dtype=jnp.float32) / (H ** 0.5)
    weight = jax.random.normal(kw, (C, H), dtype=jnp.float32) * 0.02
    bias = jax.random.normal(kb, (C,), dtype=jnp.float32) * 0.02

    out_t = final_layer_forward(x, cond_BD, scale_shift_table, weight, bias, t=t)
    out_n = final_layer_forward(x, cond_BD, scale_shift_table, weight, bias, t=None)
    jax.block_until_ready((out_t, out_n))

    ref_t = final_layer_reference(x, cond_BD, scale_shift_table, weight, bias, t=t)
    ref_n = final_layer_reference(x, cond_BD, scale_shift_table, weight, bias, t=None)
    assert out_t.shape == (B, L, C) and out_n.shape == (B, L, C)
    assert jnp.allclose(out_t, ref_t, atol=1e-4, rtol=1e-4)
    assert jnp.allclose(out_n, ref_n, atol=1e-4, rtol=1e-4)

    # ---- case 2: B=1 (grid-split path), lane-aligned H, bf16 weights/acts ----
    B2, L2, H2, C2 = 1, 64, 128, 8
    kx, kc, kt2, ks, kw, kb, key = jax.random.split(key, 7)
    x2 = jax.random.normal(kx, (B2, L2, H2), dtype=jnp.float32).astype(jnp.bfloat16)
    cond2 = jax.random.normal(kc, (B2, 1, H2), dtype=jnp.float32)
    t2 = jax.random.normal(kt2, (B2, H2), dtype=jnp.float32)
    sst2 = jax.random.normal(ks, (2, H2), dtype=jnp.float32) / (H2 ** 0.5)
    w2 = (jax.random.normal(kw, (C2, H2), dtype=jnp.float32) * 0.02).astype(jnp.bfloat16)
    b2 = jax.random.normal(kb, (C2,), dtype=jnp.float32) * 0.02

    out2 = final_layer_forward(x2, cond2, sst2, w2, b2, t=t2)
    jax.block_until_ready(out2)
    ref2 = final_layer_reference(x2.astype(jnp.float32), cond2, sst2,
                                 w2.astype(jnp.float32), b2, t=t2)
    assert out2.shape == (B2, L2, C2)
    assert jnp.allclose(out2.astype(jnp.float32), ref2, atol=5e-2, rtol=5e-2)

    print("KERNEL_OK")
</pallas_src>

<mosaic_0001>
module attributes {stable_mosaic.version = 11 : i64} {
  func.func @_final_layer_kernel(%arg0: i32, %arg1: i32, %arg2: memref<1x16x32xf32, #tpu.memory_space<vmem>>, %arg3: memref<1x1x32xf32, #tpu.memory_space<vmem>>, %arg4: memref<1x1x32xf32, #tpu.memory_space<vmem>>, %arg5: memref<32x128xf32, #tpu.memory_space<vmem>>, %arg6: memref<1x128xf32, #tpu.memory_space<vmem>>, %arg7: memref<1x16x128xf32, #tpu.memory_space<vmem>>) attributes {dimension_semantics = [#tpu.dimension_semantics<parallel>, #tpu.dimension_semantics<parallel>], iteration_bounds = array<i64: 2, 1>, scalar_prefetch = 0 : i64, scratch_operands = 0 : i64, tpu.core_type = #tpu.core_type<tc>, window_params = [{transform_indices = @transform_0, window_bounds = array<i64: 1, 16, 32>}, {transform_indices = @transform_1, window_bounds = array<i64: 1, 1, 32>}, {transform_indices = @transform_2, window_bounds = array<i64: 1, 1, 32>}, {pipeline_mode = #tpu.pipeline_mode<synchronous>, transform_indices = @transform_3, window_bounds = array<i64: 32, 128>}, {pipeline_mode = #tpu.pipeline_mode<synchronous>, transform_indices = @transform_4, window_bounds = array<i64: 1, 128>}, {transform_indices = @transform_5, window_bounds = array<i64: 1, 16, 128>}]} {
    %c0 = arith.constant 0 : index
    %c0_0 = arith.constant 0 : index
    %c0_1 = arith.constant 0 : index
    %0 = vector.load %arg2[%c0, %c0_0, %c0_1] : memref<1x16x32xf32, #tpu.memory_space<vmem>>, vector<1x16x32xf32>
    %1 = vector.shape_cast %0 : vector<1x16x32xf32> to vector<16x32xf32>
    %cst = arith.constant dense<0.000000e+00> : vector<16xf32>
    %2 = vector.multi_reduction <add>, %1, %cst [1] : vector<16x32xf32> to vector<16xf32>
    %3 = vector.shape_cast %2 : vector<16xf32> to vector<16x1xf32>
    %cst_2 = arith.constant 3.125000e-02 : f32
    %4 = vector.broadcast %cst_2 : f32 to vector<16x1xf32>
    %5 = arith.mulf %3, %4 : vector<16x1xf32>
    %6 = arith.mulf %1, %1 : vector<16x32xf32>
    %cst_3 = arith.constant dense<0.000000e+00> : vector<16xf32>
    %7 = vector.multi_reduction <add>, %6, %cst_3 [1] : vector<16x32xf32> to vector<16xf32>
    %8 = vector.shape_cast %7 : vector<16xf32> to vector<16x1xf32>
    %cst_4 = arith.constant 3.125000e-02 : f32
    %9 = vector.broadcast %cst_4 : f32 to vector<16x1xf32>
    %10 = arith.mulf %8, %9 : vector<16x1xf32>
    %11 = arith.mulf %5, %5 : vector<16x1xf32>
    %12 = arith.subf %10, %11 : vector<16x1xf32>
    %cst_5 = arith.constant 0.000000e+00 : f32
    %13 = vector.broadcast %cst_5 : f32 to vector<16x1xf32>
    %14 = arith.maximumf %12, %13 : vector<16x1xf32>
    %cst_6 = arith.constant 9.99999997E-7 : f32
    %15 = vector.broadcast %cst_6 : f32 to vector<16x1xf32>
    %16 = arith.addf %14, %15 : vector<16x1xf32>
    %17 = math.rsqrt %16 : vector<16x1xf32>
    %c0_7 = arith.constant 0 : index
    %c0_8 = arith.constant 0 : index
    %c0_9 = arith.constant 0 : index
    %18 = vector.load %arg3[%c0_7, %c0_8, %c0_9] : memref<1x1x32xf32, #tpu.memory_space<vmem>>, vector<1x1x32xf32>
    %19 = vector.shape_cast %18 : vector<1x1x32xf32> to vector<1x32xf32>
    %c0_10 = arith.constant 0 : index
    %c0_11 = arith.constant 0 : index
    %c0_12 = arith.constant 0 : index
    %20 = vector.load %arg4[%c0_10, %c0_11, %c0_12] : memref<1x1x32xf32, #tpu.memory_space<vmem>>, vector<1x1x32xf32>
    %21 = vector.shape_cast %20 : vector<1x1x32xf32> to vector<1x32xf32>
    %22 = vector.broadcast %5 : vector<16x1xf32> to vector<16x32xf32>
    %23 = arith.subf %1, %22 : vector<16x32xf32>
    %24 = vector.broadcast %17 : vector<16x1xf32> to vector<16x32xf32>
    %25 = arith.mulf %23, %24 : vector<16x32xf32>
    %26 = vector.broadcast %21 : vector<1x32xf32> to vector<16x32xf32>
    %27 = arith.mulf %25, %26 : vector<16x32xf32>
    %28 = vector.broadcast %19 : vector<1x32xf32> to vector<16x32xf32>
    %29 = arith.addf %27, %28 : vector<16x32xf32>
    %c0_13 = arith.constant 0 : index
    %c0_14 = arith.constant 0 : index
    %30 = vector.load %arg5[%c0_13, %c0_14] : memref<32x128xf32, #tpu.memory_space<vmem>>, vector<32x128xf32>
    %cst_15 = arith.constant dense<0.000000e+00> : vector<16x128xf32>
    %31 = tpu.matmul %29, %30, %cst_15 {dimension_numbers = #tpu.dot_dimension_numbers<[1], [0], [0], [1], [0, 0, 1, 1], [], []>} : vector<16x32xf32>, vector<32x128xf32>, vector<16x128xf32> -> vector<16x128xf32>
    %c0_16 = arith.constant 0 : index
    %c0_17 = arith.constant 0 : index
    %32 = vector.load %arg6[%c0_16, %c0_17] : memref<1x128xf32, #tpu.memory_space<vmem>>, vector<1x128xf32>
    %33 = vector.broadcast %32 : vector<1x128xf32> to vector<16x128xf32>
    %34 = arith.addf %31, %33 : vector<16x128xf32>
    %c0_18 = arith.constant 0 : index
    %c0_19 = arith.constant 0 : index
    %c0_20 = arith.constant 0 : index
    %35 = vector.load %arg7[%c0_18, %c0_19, %c0_20] : memref<1x16x128xf32, #tpu.memory_space<vmem>>, vector<1x16x128xf32>
    %36 = vector.shape_cast %35 : vector<1x16x128xf32> to vector<16x128xf32>
    %37 = vector.shape_cast %34 : vector<16x128xf32> to vector<1x16x128xf32>
    tpu.vector_store %arg7[%c0_18, %c0_19, %c0_20], %37 {strides = array<i32>} : memref<1x16x128xf32, #tpu.memory_space<vmem>>, vector<1x16x128xf32>,
    return
  }
  func.func @transform_0(%arg0: i32, %arg1: i32) -> (i32, i32, i32) {
    %c0_i32 = arith.constant 0 : i32
    %c0_i32_0 = arith.constant 0 : i32
    return %arg0, %arg1, %c0_i32 : i32, i32, i32
  }
  func.func @transform_1(%arg0: i32, %arg1: i32) -> (i32, i32, i32) {
    %c0_i32 = arith.constant 0 : i32
    %c0_i32_0 = arith.constant 0 : i32
    %c0_i32_1 = arith.constant 0 : i32
    return %arg0, %c0_i32, %c0_i32_0 : i32, i32, i32
  }
  func.func @transform_2(%arg0: i32, %arg1: i32) -> (i32, i32, i32) {
    %c0_i32 = arith.constant 0 : i32
    %c0_i32_0 = arith.constant 0 : i32
    %c0_i32_1 = arith.constant 0 : i32
    return %arg0, %c0_i32, %c0_i32_0 : i32, i32, i32
  }
  func.func @transform_3(%arg0: i32, %arg1: i32) -> (i32, i32) {
    %c0_i32 = arith.constant 0 : i32
    %c0_i32_0 = arith.constant 0 : i32
    %c0_i32_1 = arith.constant 0 : i32
    return %c0_i32, %c0_i32_0 : i32, i32
  }
  func.func @transform_4(%arg0: i32, %arg1: i32) -> (i32, i32) {
    %c0_i32 = arith.constant 0 : i32
    %c0_i32_0 = arith.constant 0 : i32
    %c0_i32_1 = arith.constant 0 : i32
    return %c0_i32, %c0_i32_0 : i32, i32
  }
  func.func @transform_5(%arg0: i32, %arg1: i32) -> (i32, i32, i32) {
    %c0_i32 = arith.constant 0 : i32
    %c0_i32_0 = arith.constant 0 : i32
    return %arg0, %arg1, %c0_i32 : i32, i32, i32
  }
}

</mosaic_0001>

<bundles_post_ra>
// kernel: tpu_custom_call.1
= control target key start
LH: loop header
LB: loop body
LE: loop exit
PB: predicated region body
PF: predicated region fallthrough
CT: control target
= control target key end

     0   :  { %s1178_s0 = inlined_call_operand.hbm [shape: f32[2,16,32], index: 0, kind: input, shape index: {}]   ;;  %s1179_s1 = inlined_call_operand.hbm [shape: f32[2,1,32], index: 1, kind: input, shape index: {}]   ;;  %s1180_s2 = inlined_call_operand.vmem [shape: f32[2,1,32], index: 2, kind: input, shape index: {}]   ;;  %s1181_s3 = inlined_call_operand.hbm [shape: f32[32,128], index: 3, kind: input, shape index: {}]   ;;  %s1182_s4 = inlined_call_operand.vmem [shape: f32[1,128], index: 4, kind: input, shape index: {}]   ;;  %s1183_s5 = inlined_call_operand.hbm [shape: f32[2,16,128], index: 5, kind: output, shape index: {}]  }
   0x1   :  { %1191 = sst [smem:[#allocation18_spill]] %s1178_s0 }
   0x2   :  { %1192 = sst [smem:[#allocation19_spill]] %s1181_s3 }
   0x3   :  { %10 = vsyncpa [#allocation3], 0 }
   0x4   :  { %12 = vsyncpa [#allocation3 + $0x1], 0 }
   0x5   :  { %13 = vsyncpa [#allocation6], 0 }
   0x6   :  { %15 = vsyncpa [#allocation6 + $0x1], 0 }
   0x7   :  { %16 = vsyncpa [#allocation4], 0 }
   0x8   :  { %18 = vsyncpa [#allocation4 + $0x1], 0  ;;  %s951_s18 = smov 0   ;;  %s953_s19 = smov 0  }
   0x9   :  { %s955_s20 = smov 0   ;;  %s957_s21 = smov 0  }
   0xa   :  { %s959_s22 = smov 0   ;;  %s961_s23 = smov 0  }
   0xb LB: > { %1193 = sst [smem:[#allocation13_spill]] %s899_s20  ;;  %s982_s24 = sadd.s32 4294967295, %s911_s23   ;;  %s911_s23 = sphi %s961_s23, %s24_s23   ;;  %s907_s22 = sphi %s959_s22, %s1219_s22   ;;  %s903_s21 = sphi %s957_s21, %s1218_s21   ;;  %s899_s20 = sphi %s955_s20, %s1214_s20   ;;  %s895_s19 = sphi %s953_s19, %s1217_s19   ;;  %s891_s18 = sphi %s951_s18, %s1216_s18  }
   0xc   : > { %1194 = sst [smem:[#allocation14_spill]] %s911_s23  ;;  %s614_s25 = sadd.s32 4294967294, %s911_s23  }
   0xd   : > { %p58_p0 = scmp.ne.s32.totalorder %s895_s19, %s891_s18  ;;  %p59_p1 = scmp.eq.s32.totalorder %s982_s24, 0 }
   0xe   : > { %p184_p3 = scmp.eq.s32.totalorder %s614_s25, 1  ;;  %p615_p5 = scmp.ge.s32.totalorder %s911_s23, 1 }
   0xf   : > { %p991_p4 = por %p59_p1, %p58_p0  ;;  %p191_p7 = scmp.lt.s32.totalorder %s911_s23, 3 }
  0x10   : > { %p996_p6 = por %p184_p3, %p58_p0  ;;  %s913_s29 = smov [#allocation7]  }
  0x11   : > { %p1001_p8 = pnand %p615_p5, %p191_p7  ;;  %s203_s30 = sshll.u32 %s913_s29, 4  ;;  %s204_s30 = int_to_ptr.vmem [resolvable:$true] %s203_s30 }
  0x12   : > { %s1196_s27 = scalar_select %p996_p6, 1, 0 }
  0x13   : > { %p665_p9 = pneg %p1001_p8  ;;  %p617_p10 = scmp.ge.s32.totalorder %s911_s23, 2 }
  0x14   : > { %1197 = sst [smem:[#allocation15_spill]] %s1196_s27  ;;  %s36_s7 = sadd.s32 1, %s907_s22 }
  0x15   : > { %p1010_p11 = pnand %p665_p9, %p59_p1  ;;  %s752_s8 = scalar_lea.vmem %s204_s30, 512 }
  0x16   : > { %p753_p13 = scmp.ne.s32.totalorder %s204_s30, %s752_s8  ;;  %p760_p5 = scmp.lt.s32.totalorder %s204_s30, %s204_s30 }
  0x17   : > { %p743_p12 = pneg %p1010_p11  ;;  %p761_p7 = scmp.lt.s32.totalorder %s752_s8, %s752_s8 }
  0x19   : > { %p755_p0 = pnand %p753_p13, %p743_p12  ;;  %p762_p2 = por %p761_p7, %p760_p5 }
  0x1b   : > { %p756_p3 = pneg %p755_p0 }
  0x1d   : > { %p763_p6 = pnand %p762_p2, %p756_p3 }
  0x1f   : > { %766 = shalt.err (!%p763_p6)
}
  0x20   : > { %s1184_s9 = smov 128   ;;  %s1185_s10 = smov 8  }
  0x21   : > { %s1200_s3 = sld [smem:[#allocation19_spill]]  ;;  %p38_p2 = scmp.ge.s32.totalorder %s36_s7, 2 }
  0x22   : > { %s45_s13 = sadd.s32 1, %s899_s20  ;;  %p52_p6 = scmp.ne.s32.totalorder %s899_s20, %s895_s19 }
  0x23   : > { %p53_p9 = scmp.eq.s32.totalorder %s911_s23, 0  ;;  %s1221_s7 = smov (%p38_p2, %s36_s7), 0 }
  0x24   : > { %1201 = sst [smem:[#allocation16_spill]] %s1221_s7  ;;  %p1203_p13 = scmp.eq.s32.totalorder %s982_s24, 1 }
  0x25   : > { %p1031_p12 = por %p53_p9, %p52_p6  ;;  %s40_s16 = ssub.s32 %s907_s22, %s1221_s7 }
  0x26   : > { %p1037_p0 = por %p1203_p13, %p52_p6  ;;  %p43_p3 = scmp.eq.s32.totalorder %s40_s16, 0 }
  0x27   : > { %668 = dma.hbm_to_vmem [thread:$0]  (!%p1010_p11), %s1200_s3, 512, %s204_s30, [#allocation6], %s1184_s9, %s1184_s9, %s1185_s10  }
  0x28   : > { %p681_p11 = scmp.lt.s32.totalorder %s911_s23, 2  ;;  %s1045_s17 = sand.u32 1, %s899_s20  }
  0x29   : > { %s618_s25 = sshll.u32 %s1045_s17, 4  ;;  %s636_s30 = sshll.u32 %s907_s22, 8 }
  0x2a   : > { %s1049_s29 = scalar_select %p43_p3, %s899_s20, %s45_s13  }
  0x2b   : > { %s1206_s0 = sld [smem:[#allocation18_spill]]  ;;  %s224_s12 = scalar_lea.vmem [#allocation2], %s618_s25 }
  0x2c   : > { %1205 = sst [smem:[#allocation17_spill]] %s1049_s29  ;;  %s233_s9 = sshll.u32 %s224_s12, 4  ;;  %s234_s9 = int_to_ptr.vmem [resolvable:$true] %s233_s9 }
  0x2d   : > { %p1057_p5 = pnand %p681_p11, %p1031_p12  ;;  %s243_s16 = sand.u32 1, %s911_s23  }
  0x2e   : > { %s221_s3 = scalar_lea.sflag [#allocation3], %s1045_s17  ;;  %s780_s13 = scalar_lea.vmem %s234_s9, 256 }
  0x2f   : > { %p769_p7 = pneg %p1057_p5  ;;  %p781_p2 = scmp.ne.s32.totalorder %s234_s9, %s780_s13 }
  0x30   : > { %s916_s25 = smov [#allocation2]  }
  0x31   : > { %s232_s11 = scalar_lea.hbm %s1206_s0, %s636_s30  ;;  %p783_p6 = pnand %p781_p2, %p769_p7 }
  0x32   : > { %s785_s30 = sshll.u32 %s916_s25, 4  ;;  %s786_s30 = int_to_ptr.vmem [resolvable:$false] %s785_s30 }
  0x33   : > { %p784_p9 = pneg %p783_p6  ;;  %s787_s14 = scalar_lea.vmem %s786_s30, 512 }
  0x34   : > { %p788_p12 = scmp.lt.s32.totalorder %s234_s9, %s786_s30  ;;  %p789_p13 = scmp.lt.s32.totalorder %s787_s14, %s780_s13 }
  0x36   : > { %p790_p11 = por %p789_p13, %p788_p12 }
  0x38   : > { %p791_p3 = pnand %p790_p11, %p784_p9 }
  0x3a   : > { %794 = shalt.err (!%p791_p3)
}
  0x3b   : > { %s1208_s6 = smov 8   ;;  %s1209_s8 = smov 128  }
  0x3c   : > { %672 = dma.hbm_to_vmem [thread:$0]  (!%p1057_p5), %s232_s11, 256, %s234_s9, %s221_s3, %s1209_s8, %s1209_s8, %s1208_s6  }
  0x3d   : > { %s621_s12 = sshll.u32 %s907_s22, 4  ;;  %s246_s0 = scalar_lea.vmem [#allocation5], %s1045_s17 }
  0x3e   : > { %s253_s7 = sshll.u32 %s246_s0, 4  ;;  %s251_s30 = scalar_lea.hbm %s1179_s1, %s621_s12  ;;  %s254_s7 = int_to_ptr.vmem [resolvable:$true] %s253_s7 }
  0x3f   : > { %s244_s13 = scalar_lea.sflag [#allocation6], %s243_s16  ;;  %s808_s14 = scalar_lea.vmem %s254_s7, 16 }
  0x40   : > { %p809_p2 = scmp.ne.s32.totalorder %s254_s7, %s808_s14  ;;  %s917_s20 = smov [#allocation5]  }
  0x41   : > { %s813_s23 = sshll.u32 %s917_s20, 4  ;;  %s814_s23 = int_to_ptr.vmem [resolvable:$false] %s813_s23 }
  0x42   : > { %p811_p6 = pnand %p809_p2, %p769_p7  ;;  %s815_s27 = scalar_lea.vmem %s814_s23, 32 }
  0x43   : > { %p816_p12 = scmp.lt.s32.totalorder %s254_s7, %s814_s23  ;;  %p817_p13 = scmp.lt.s32.totalorder %s815_s27, %s808_s14 }
  0x44   : > { %p812_p9 = pneg %p811_p6 }
  0x45   : > { %p818_p11 = por %p817_p13, %p816_p12 }
  0x47   : > { %p819_p3 = pnand %p818_p11, %p812_p9 }
  0x49   : > { %822 = shalt.err (!%p819_p3)
}
  0x4a   : > { %675 = dma.hbm_to_vmem [thread:$0]  (!%p1057_p5), %s251_s30, 16, %s254_s7, %s244_s13  }
  0x4b   : > { %268 = sbr.rel (%p1001_p8) target bundleno = 471 (0x1d7), region = 40  ;;  %s1086_s0 = sand.u32 (!%p1001_p8), 1, %s895_s19  }
  0x4c   : > { %s623_s3 = sshll.u32 (!%p1001_p8), %s1086_s0, 4  ;;  %s271_s20 = scalar_lea.sflag (!%p1001_p8), [#allocation3], %s1086_s0 }
  0x4d   : > { %s274_s23 = scalar_lea.vmem (!%p1001_p8), [#allocation2], %s623_s3 }
  0x50   : > { %874 = dma.done.wait (%p991_p4), %s271_s20, 256  }
  0x51   : > { %876 = vsyncadd (%p991_p4), %s271_s20, 4294967040  ;;  %s279_s27 = sand.u32 1, %s982_s24   ;;  %s282_s7 = scalar_lea.vmem [#allocation5], %s1086_s0 }
  0x52   : > { %s280_s28 = scalar_lea.sflag [#allocation6], %s279_s27 }
  0x53   : > { %878 = dma.done.wait (%p991_p4), %s280_s28, 16  }
  0x54   : > { %880 = vsyncadd (%p991_p4), %s280_s28, 4294967280 }
  0x55   : > { %882 = dma.done.wait (%p59_p1), [#allocation6], 512  }
  0x56   : > { %884 = vsyncadd (%p59_p1), [#allocation6], 4294966784  ;;  %vm327_vm0 = vcmask 261120   ;;  %v325_v0 = vld [vmem:[%s274_s23] sm:$0xff]  ;;  %v326_v1 = vld [vmem:[%s274_s23 + $0x8] sm:$0xff]  ;;  %p321_p1 = scmp.lt.s32.totalorder %s903_s21, 1 }
  0x57   : > { %v328_v2 = vsel %vm327_vm0, %v325_v0, 0.0  ;;  %v336_v3 = vmul.f32 %v325_v0, %v325_v0  ;;  %v337_v4 = vmul.f32 %v326_v1, %v326_v1  ;;  %v331_v6 = vsel %vm327_vm0, %v326_v1, 0.0  ;;  %v381_v8 = vld [vmem:[#allocation7 + $0x18] sm:$0xff]  ;;  %v380_v9 = vld [vmem:[#allocation7 + $0x10] sm:$0xff]  ;;  %v379_v10 = vld [vmem:[#allocation7 + $0x8] sm:$0xff]  ;;  %s319_s11 = scalar_lea.vmem [#allocation8], %s623_s3 }
  0x58   : > { %329 = vadd.xlane.f32.xlu0 %v328_v2  ;;  %644 = vmatprep.subr.mxu0 %v381_v8  ;;  %v378_v11 = vld [vmem:[#allocation7] sm:$0xff]  ;;  %s322_s24 = scalar_select %p321_p1, %s903_s21, 1  ;;  %v627_v32 = vld [vmem:[%s282_s7] ss:$0 sm:$0xff] }
  0x59   : > { %v338_v5 = vsel %vm327_vm0, %v336_v3, 0.0  ;;  %v341_v7 = vsel %vm327_vm0, %v337_v4, 0.0  ;;  %645 = vmatpush3.msra.mxu0 %v381_v8  ;;  %v628_v40 = vld [vmem:[%s1182_s4] ss:$0 sm:$0xff]  ;;  %s488_s16 = sshll.u32 %s319_s11, 4  ;;  %s637_s6 = sshll.u32 %s903_s21, 8  ;;  %s1125_s16 = int_to_ptr.vmem [resolvable:$true] %s488_s16 }
  0x5a   : > { %339 = vadd.xlane.f32.xlu1 %v338_v5  ;;  %646 = vmatprep.subr.mxu0 %v380_v9  ;;  %s323_s10 = scalar_lea.vmem %s1180_s2, %s322_s24  ;;  %s1130_s25 = scalar_lea.hbm %s1183_s5, %s637_s6 }
  0x5b   : > { %647 = vmatpush3.msra.mxu0 %v380_v9  ;;  %v626_v30 = vld [vmem:[%s323_s10] ss:$0 sm:$0xff]  ;;  %s473_s30 = scalar_lea.sflag [#allocation4], %s1086_s0  ;;  %s823_s13 = scalar_lea.vmem %s1125_s16, 256 }
  0x5c   : > { %332 = vadd.xlane.f32.xlu0 %v331_v6  ;;  %648 = vmatprep.subr.mxu0 %v379_v10  ;;  %p824_p4 = scmp.ne.s32.totalorder %s1125_s16, %s823_s13  ;;  %s918_s21 = smov [#allocation8]  }
  0x5d   : > { %649 = vmatpush3.msra.mxu0 %v379_v10  ;;  %s827_s14 = sshll.u32 %s918_s21, 4  ;;  %s828_s14 = int_to_ptr.vmem [resolvable:$false] %s827_s14 }
  0x5e   : > { %342 = vadd.xlane.f32.xlu1 %v341_v7  ;;  %650 = vmatprep.subr.mxu0 %v378_v11  ;;  %p825_p8 = pnand %p824_p4, %p1037_p0  ;;  %s829_s3 = scalar_lea.vmem %s828_s14, 512 }
  0x5f   : > { %651 = vmatpush3.msra.mxu0 %v378_v11  ;;  %p830_p7 = scmp.lt.s32.totalorder %s1125_s16, %s828_s14  ;;  %p831_p2 = scmp.lt.s32.totalorder %s829_s3, %s823_s13 }
  0x60   : > { %p826_p5 = pneg %p825_p8 }
  0x61   : > { %p832_p6 = por %p831_p2, %p830_p7 }
  0x63   : > { %p833_p9 = pnand %p832_p6, %p826_p5 }
  0xe1   : > { %v330_v12 = vpop.xlane.xlu0 %329 }
  0xe2   : > { %v334_v13 = vmul.f32 0.03125, %v330_v12 }
  0xe3   : > { %v340_v14 = vpop.xlane.xlu1 %339 }
  0xe4   : > { %v346_v15 = vmul.f32 %v334_v13, %v334_v13  ;;  %v344_v16 = vmul.f32 0.03125, %v340_v14  ;;  %v358_v28 = vsub.f32 %v325_v0, %v334_v13 }
  0xe5   : > { %v333_v17 = vpop.xlane.xlu0 %332 }
  0xe6   : > { %v348_v18 = vsub.f32 %v344_v16, %v346_v15  ;;  %v335_v19 = vmul.f32 0.03125, %v333_v17 }
  0xe7   : > { %v343_v20 = vpop.xlane.xlu1 %342 }
  0xe8   : > { %v350_v21 = vmax.f32 %v348_v18, 0.0  ;;  %v347_v22 = vmul.f32 %v335_v19, %v335_v19  ;;  %v345_v23 = vmul.f32 0.03125, %v343_v20  ;;  %v359_v33 = vsub.f32 %v326_v1, %v335_v19 }
  0xea   : > { %v352_v24 = vadd.f32 1e-06, %v350_v21  ;;  %v349_v25 = vsub.f32 %v345_v23, %v347_v22 }
  0xec   : > { %737 = vrsqrt.f32 %v352_v24  ;;  %v351_v26 = vmax.f32 %v349_v25, 0.0 }
  0xee   : > { %v353_v27 = vadd.f32 1e-06, %v351_v26 }
  0xf0   : > { %739 = vrsqrt.f32 %v353_v27 }
  0xf9   : > { %v738_v29 = vpop.eup %737 }
  0xfa   : > { %v360_v31 = vmul.f32 %v738_v29, %v358_v28 }
  0xfc   : > { %v368_v34 = vmul.f32 %v626_v30, %v360_v31 }
  0xfd   : > { %v740_v35 = vpop.eup %739 }
  0xfe   : > { %v361_v36 = vmul.f32 %v740_v35, %v359_v33  ;;  %v376_v37 = vadd.f32 %v627_v32, %v368_v34 }
 0x100   : > { %v369_v38 = vmul.f32 %v626_v30, %v361_v36  ;;  %652 = vmatprep.mubr.msk.f32.mxu0 %vm327_vm0, %v376_v37 }
 0x102   : > { %v377_v39 = vadd.f32 %v627_v32, %v369_v38 }
 0x104   : > { %653 = vmatmul.mubr.msk.f32.vlgmr.msra.gmra.mxu0 %vm327_vm0, %v377_v39 }
 0x1c4   : > { %v654_v41 = vpop.f32.mrf.mxu0 }
 0x1c5   : > { %v467_v42 = vadd.f32 %v654_v41, %v628_v40 }
 0x1c6   : > { %v461_v43 = vpop.f32.mrf.mxu0 }
 0x1c7   : > { %471 = vst [vmem:[%s319_s11 + $0x8] sm:$0xff] %v467_v42  ;;  %v462_v44 = vadd.f32 %v628_v40, %v461_v43 }
 0x1c9   : > { %470 = vst [vmem:[%s319_s11] sm:$0xff] %v462_v44 }
 0x1ca   : > { %836 = shalt.err (!%p833_p9)
}
 0x1cb   : > { %s837_s20 = scalar_lea.hbm %s1130_s25, 256  ;;  %s841_s28 = scalar_lea.hbm %s1183_s5, 512 }
 0x1cc   : > { %p838_p12 = scmp.ne.s32.totalorder %s1130_s25, %s837_s20  ;;  %p842_p3 = scmp.lt.s32.totalorder %s1130_s25, %s1183_s5 }
 0x1cd   : > { %p843_p1 = scmp.lt.s32.totalorder %s841_s28, %s837_s20 }
 0x1ce   : > { %p839_p13 = pnand %p838_p12, %p1037_p0 }
 0x1cf   : > { %p844_p4 = por %p843_p1, %p842_p3 }
 0x1d0   : > { %p840_p11 = pneg %p839_p13 }
 0x1d2   : > { %p845_p8 = pnand %p844_p4, %p840_p11 }
 0x1d4   : > { %848 = shalt.err (!%p845_p8)
}
 0x1d5   : > { %s919_s26 = smov 128   ;;  %s920_s9 = smov 8  }
 0x1d6   : > { %663 = dma.vmem_to_hbm [thread:$0]  (%p1037_p0), %s1125_s16, 256, %s1130_s25, %s473_s30, %s919_s26, %s919_s26, %s920_s9  }
 0x1d7 PF: > { %s1210_s10 = sld [smem:[#allocation15_spill]]  ;;  %s503_s29 = sand.u32 1, %s891_s18  }
 0x1d8   : > { %s1211_s17 = sld [smem:[#allocation14_spill]]  ;;  %s504_s11 = scalar_lea.sflag [#allocation4], %s503_s29 }
 0x1dd   : > { %p1212_p5 = scmp.ne.s32.totalorder %s1210_s10, 0 }
 0x1df   : > { %p677_p7 = pnand %p617_p10, %p1212_p5 }
 0x1e1   : > { %p678_p2 = pneg %p677_p7 }
 0x1e3   : > { %886 = dma.done.wait (%p678_p2), %s504_s11, 256  }
 0x1e4   : > { %888 = vsyncadd (%p678_p2), %s504_s11, 4294967040  ;;  %s24_s23 = sadd.s32 1, %s1211_s17   ;;  %s1213_s6 = sld [smem:[#allocation13_spill]] }
 0x1e5   : > { %p21_p6 = scmp.ge.s32.totalorder %s24_s23, 4   ;;  %s1214_s20 = sld [smem:[#allocation17_spill]] }
 0x1e6   : > { %s1215_s15 = sld [smem:[#allocation16_spill]]  ;;  %s1216_s18 = smov %s895_s19 }
 0x1e7   : > { %s1218_s21 = smov %s907_s22 }
 0x1e8   :  { %23 = sbr.rel (!%p21_p6) target bundleno = 11 (0xb), region = 105 }
 0x1ea   : > { %s1217_s19 = smov %s1213_s6 }
 0x1ec   : > { %s1219_s22 = smov %s1215_s15 }
 0x1ed   :  { %509 = vsyncpa [#allocation3], 1 }
 0x1ee   :  { %511 = vsyncpa [#allocation3 + $0x1], 1 }
 0x1ef   :  { %512 = vsyncpa [#allocation6], 1 }
 0x1f0   :  { %514 = vsyncpa [#allocation6 + $0x1], 1 }
 0x1f1   :  { %515 = vsyncpa [#allocation4], 1 }
 0x1f2   :  { %517 = vsyncpa [#allocation4 + $0x1], 1 }

</bundles_post_ra>
